<compile_context>
chip_gen: v6e
topology: v6e:2x2x1
jax: 0.10.0
libtpu: 0.0.40
codegen_flags: <defaults>
</compile_context>

<pallas_src>
import functools

import jax
import jax.numpy as jnp
from jax.experimental import pallas as pl
from jax.experimental.pallas import tpu as pltpu


def mhsa_kernel(x_ref, wv_ref, bv_ref, wo_ref, bo_ref, o_ref, *, seq_len):
    # One batch element per grid step.
    x = x_ref[0]                                                    # (S, E) bf16

    # Reduce x over the sequence axis with f32 accumulation (XLU reduction).
    xsum = jnp.sum(x.astype(jnp.float32), axis=0, keepdims=True)    # (1, E)

    # V projection of the summed row: sum_s (x_s @ Wv + bv) == xsum @ Wv + S*bv
    # (exact by linearity).  bf16 MXU inputs, f32 accumulation.
    vsum = jnp.dot(xsum.astype(jnp.bfloat16), wv_ref[...],
                   preferred_element_type=jnp.float32)
    vsum = vsum + jnp.float32(seq_len) * bv_ref[...]                 # (1, E)

    # Output projection of the (identical) per-position row.
    row = jnp.dot(vsum.astype(jnp.bfloat16), wo_ref[...],
                  preferred_element_type=jnp.float32) + bo_ref[...]  # (1, E)

    # Every query position gets the same row: one lane-dense full-width store.
    o_ref[0] = jnp.broadcast_to(row, (seq_len, row.shape[-1])).astype(o_ref.dtype)


def multi_head_self_attention(x, wqkv, bqkv, wout, bout, *, num_heads):
    """x: (B, S, E) f32.  wqkv: (E, 3E), bqkv: (3E,), wout: (E, E), bout: (E,).

    Weights are passed pre-transposed as (in_features, out_features).
    """
    B, S, E = x.shape
    assert E % num_heads == 0, "embed_dim must be divisible by num_heads"

    # Only the V columns of the QKV projection reach the output (see header).
    wv = wqkv[:, 2 * E:].astype(jnp.bfloat16)            # (E, E)
    bv = bqkv[2 * E:].reshape(1, E).astype(jnp.float32)  # (1, E)
    wo = wout.astype(jnp.bfloat16)                       # (E, E)
    bo = bout.reshape(1, E).astype(jnp.float32)          # (1, E)
    x_bf16 = x.astype(jnp.bfloat16)                      # halve x HBM traffic

    kernel = functools.partial(mhsa_kernel, seq_len=S)

    # Right-sized VMEM budget: double-buffered x / out tiles + resident bf16
    # weights + biases, 2x headroom, capped at 48 MiB so it fits v7x (64 MiB
    # physical) as well as v5e/v6e (128 MiB).
    footprint = (2 * S * E * 2            # x tile (bf16), double-buffered
                 + 2 * S * E * 4          # out tile (f32), double-buffered
                 + 2 * 2 * E * E * 2      # Wv + Wout (bf16), default 2-deep
                 + 2 * 2 * E * 4)         # biases (f32)
    vmem_limit = int(min(48 * 1024 * 1024, max(16 * 1024 * 1024, 2 * footprint)))

    flops = B * (S * E                    # seq reduction of x
                 + 2 * E * E              # V-projection GEMV
                 + 2 * E * E              # output-projection GEMV
                 + S * E)                 # broadcast store
    bytes_accessed = (x_bf16.size * 2 + B * S * E * 4
                      + wv.size * 2 + wo.size * 2 + (bv.size + bo.size) * 4)
    cost = pl.CostEstimate(flops=flops, transcendentals=0,
                           bytes_accessed=bytes_accessed)

    # TODO(synk): at transformer-scale E, single-buffer the constant weight
    # blocks (pipeline_mode=pl.Buffered(1)) or stream them K-tiled; at these
    # shapes the default double-buffering costs a few KiB and isn't worth it.
    # TODO(synk): if a (S, E) block per batch exceeds the VMEM budget (large S
    # and E), add a seq-tile grid axis: pass 1 accumulates xsum per batch,
    # pass 2 broadcast-writes output tiles; also gives v7x a second parallel
    # axis when B == 1.
    return pl.pallas_call(
        kernel,
        out_shape=jax.ShapeDtypeStruct((B, S, E), x.dtype),
        grid_spec=pltpu.PrefetchScalarGridSpec(
            num_scalar_prefetch=0,
            grid=(B,),
            in_specs=[
                pl.BlockSpec((1, S, E), lambda b: (b, 0, 0)),  # x (bf16, per-batch)
                pl.BlockSpec((E, E), lambda b: (0, 0)),        # Wv (bf16, resident)
                pl.BlockSpec((1, E), lambda b: (0, 0)),        # bv
                pl.BlockSpec((E, E), lambda b: (0, 0)),        # Wout (bf16, resident)
                pl.BlockSpec((1, E), lambda b: (0, 0)),        # bout
            ],
            out_specs=pl.BlockSpec((1, S, E), lambda b: (b, 0, 0)),
        ),
        compiler_params=pltpu.CompilerParams(
            dimension_semantics=("parallel",),
            vmem_limit_bytes=vmem_limit),
        cost_estimate=cost,
    )(x_bf16, wv, bv, wo, bo)


def reference(x, wqkv, bqkv, wout, bout, num_heads):
    """Pure-JAX f32 replica of the PyTorch forward (including its einsum semantics)."""
    B, S, E = x.shape
    D = E // num_heads
    qkv = x @ wqkv + bqkv                                       # (B, S, 3E)
    qkv = qkv.reshape(B, S, 3, num_heads, D).transpose(2, 0, 3, 1, 4)
    q, k, v = qkv[0], qkv[1], qkv[2]                            # (B, H, S, D)
    energy = jnp.einsum('bhqd,bhkd->bhqk', q, k)
    attn = jax.nn.softmax(energy / jnp.sqrt(jnp.float32(D)), axis=-1)
    out = jnp.einsum('bhqk,bhvd->bhqd', attn, v)                # same (degenerate) einsum
    out = out.transpose(0, 2, 1, 3).reshape(B, S, E)
    return out @ wout + bout


if __name__ == "__main__":
    B, S, E, H = 2, 8, 32, 4

    key = jax.random.PRNGKey(0)
    kx, k1, k2, k3, k4 = jax.random.split(key, 5)

    x = jax.random.normal(kx, (B, S, E), dtype=jnp.float32)

    # Deterministic parameter init (nn.Linear-like uniform bounds), stored
    # transposed as (in, out) for the kernel.
    bound = 1.0 / jnp.sqrt(jnp.float32(E))
    wqkv = jax.random.uniform(k1, (E, 3 * E), jnp.float32, -bound, bound)
    bqkv = jax.random.uniform(k2, (3 * E,), jnp.float32, -bound, bound)
    wout = jax.random.uniform(k3, (E, E), jnp.float32, -bound, bound)
    bout = jax.random.uniform(k4, (E,), jnp.float32, -bound, bound)

    out = multi_head_self_attention(x, wqkv, bqkv, wout, bout, num_heads=H)
    out = jax.block_until_ready(out)

    ref = reference(x, wqkv, bqkv, wout, bout, H)
    assert out.shape == (B, S, E)
    # bf16 GEMV inputs (f32 accumulation) vs the f32 reference -> relaxed tolerance.
    assert jnp.allclose(out, ref, atol=2e-2, rtol=2e-2), "mismatch vs reference"

    print("KERNEL_OK")
</pallas_src>

<mosaic_0001>
module attributes {stable_mosaic.version = 11 : i64} {
  func.func @mhsa_kernel(%arg0: i32, %arg1: memref<1x8x32xbf16, #tpu.memory_space<vmem>>, %arg2: memref<32x32xbf16, #tpu.memory_space<vmem>>, %arg3: memref<1x32xf32, #tpu.memory_space<vmem>>, %arg4: memref<32x32xbf16, #tpu.memory_space<vmem>>, %arg5: memref<1x32xf32, #tpu.memory_space<vmem>>, %arg6: memref<1x8x32xf32, #tpu.memory_space<vmem>>) attributes {dimension_semantics = [#tpu.dimension_semantics<parallel>], iteration_bounds = array<i64: 2>, scalar_prefetch = 0 : i64, scratch_operands = 0 : i64, tpu.core_type = #tpu.core_type<tc>, window_params = [{transform_indices = @transform_0, window_bounds = array<i64: 1, 8, 32>}, {pipeline_mode = #tpu.pipeline_mode<synchronous>, transform_indices = @transform_1, window_bounds = array<i64: 32, 32>}, {pipeline_mode = #tpu.pipeline_mode<synchronous>, transform_indices = @transform_2, window_bounds = array<i64: 1, 32>}, {pipeline_mode = #tpu.pipeline_mode<synchronous>, transform_indices = @transform_3, window_bounds = array<i64: 32, 32>}, {pipeline_mode = #tpu.pipeline_mode<synchronous>, transform_indices = @transform_4, window_bounds = array<i64: 1, 32>}, {transform_indices = @transform_5, window_bounds = array<i64: 1, 8, 32>}]} {
    %c0 = arith.constant 0 : index
    %c0_0 = arith.constant 0 : index
    %c0_1 = arith.constant 0 : index
    %0 = vector.load %arg1[%c0, %c0_0, %c0_1] : memref<1x8x32xbf16, #tpu.memory_space<vmem>>, vector<1x8x32xbf16>
    %1 = vector.shape_cast %0 : vector<1x8x32xbf16> to vector<8x32xbf16>
    %2 = arith.extf %1 : vector<8x32xbf16> to vector<8x32xf32>
    %cst = arith.constant dense<0.000000e+00> : vector<32xf32>
    %3 = vector.multi_reduction <add>, %2, %cst [0] : vector<8x32xf32> to vector<32xf32>
    %4 = vector.shape_cast %3 : vector<32xf32> to vector<1x32xf32>
    %5 = arith.truncf %4 : vector<1x32xf32> to vector<1x32xbf16>
    %c0_2 = arith.constant 0 : index
    %c0_3 = arith.constant 0 : index
    %6 = vector.load %arg2[%c0_2, %c0_3] : memref<32x32xbf16, #tpu.memory_space<vmem>>, vector<32x32xbf16>
    %cst_4 = arith.constant dense<0.000000e+00> : vector<1x32xf32>
    %7 = tpu.matmul %5, %6, %cst_4 {dimension_numbers = #tpu.dot_dimension_numbers<[1], [0], [0], [1], [0, 0, 1, 1], [], []>} : vector<1x32xbf16>, vector<32x32xbf16>, vector<1x32xf32> -> vector<1x32xf32>
    %c0_5 = arith.constant 0 : index
    %c0_6 = arith.constant 0 : index
    %8 = vector.load %arg3[%c0_5, %c0_6] : memref<1x32xf32, #tpu.memory_space<vmem>>, vector<1x32xf32>
    %cst_7 = arith.constant 8.000000e+00 : f32
    %9 = vector.broadcast %cst_7 : f32 to vector<1x32xf32>
    %10 = arith.mulf %9, %8 : vector<1x32xf32>
    %11 = arith.addf %7, %10 : vector<1x32xf32>
    %12 = arith.truncf %11 : vector<1x32xf32> to vector<1x32xbf16>
    %c0_8 = arith.constant 0 : index
    %c0_9 = arith.constant 0 : index
    %13 = vector.load %arg4[%c0_8, %c0_9] : memref<32x32xbf16, #tpu.memory_space<vmem>>, vector<32x32xbf16>
    %cst_10 = arith.constant dense<0.000000e+00> : vector<1x32xf32>
    %14 = tpu.matmul %12, %13, %cst_10 {dimension_numbers = #tpu.dot_dimension_numbers<[1], [0], [0], [1], [0, 0, 1, 1], [], []>} : vector<1x32xbf16>, vector<32x32xbf16>, vector<1x32xf32> -> vector<1x32xf32>
    %c0_11 = arith.constant 0 : index
    %c0_12 = arith.constant 0 : index
    %15 = vector.load %arg5[%c0_11, %c0_12] : memref<1x32xf32, #tpu.memory_space<vmem>>, vector<1x32xf32>
    %16 = arith.addf %14, %15 : vector<1x32xf32>
    %17 = vector.shape_cast %16 : vector<1x32xf32> to vector<1x32xf32>
    %18 = vector.broadcast %17 : vector<1x32xf32> to vector<8x32xf32>
    %c0_13 = arith.constant 0 : index
    %c0_14 = arith.constant 0 : index
    %c0_15 = arith.constant 0 : index
    %19 = vector.load %arg6[%c0_13, %c0_14, %c0_15] : memref<1x8x32xf32, #tpu.memory_space<vmem>>, vector<1x8x32xf32>
    %20 = vector.shape_cast %19 : vector<1x8x32xf32> to vector<8x32xf32>
    %21 = vector.shape_cast %18 : vector<8x32xf32> to vector<1x8x32xf32>
    tpu.vector_store %arg6[%c0_13, %c0_14, %c0_15], %21 {strides = array<i32>} : memref<1x8x32xf32, #tpu.memory_space<vmem>>, vector<1x8x32xf32>,
    return
  }
  func.func @transform_0(%arg0: i32) -> (i32, i32, i32) {
    %c0_i32 = arith.constant 0 : i32
    %c0_i32_0 = arith.constant 0 : i32
    %c0_i32_1 = arith.constant 0 : i32
    return %arg0, %c0_i32, %c0_i32_0 : i32, i32, i32
  }
  func.func @transform_1(%arg0: i32) -> (i32, i32) {
    %c0_i32 = arith.constant 0 : i32
    %c0_i32_0 = arith.constant 0 : i32
    %c0_i32_1 = arith.constant 0 : i32
    return %c0_i32, %c0_i32_0 : i32, i32
  }
  func.func @transform_2(%arg0: i32) -> (i32, i32) {
    %c0_i32 = arith.constant 0 : i32
    %c0_i32_0 = arith.constant 0 : i32
    %c0_i32_1 = arith.constant 0 : i32
    return %c0_i32, %c0_i32_0 : i32, i32
  }
  func.func @transform_3(%arg0: i32) -> (i32, i32) {
    %c0_i32 = arith.constant 0 : i32
    %c0_i32_0 = arith.constant 0 : i32
    %c0_i32_1 = arith.constant 0 : i32
    return %c0_i32, %c0_i32_0 : i32, i32
  }
  func.func @transform_4(%arg0: i32) -> (i32, i32) {
    %c0_i32 = arith.constant 0 : i32
    %c0_i32_0 = arith.constant 0 : i32
    %c0_i32_1 = arith.constant 0 : i32
    return %c0_i32, %c0_i32_0 : i32, i32
  }
  func.func @transform_5(%arg0: i32) -> (i32, i32, i32) {
    %c0_i32 = arith.constant 0 : i32
    %c0_i32_0 = arith.constant 0 : i32
    %c0_i32_1 = arith.constant 0 : i32
    return %arg0, %c0_i32, %c0_i32_0 : i32, i32, i32
  }
}

</mosaic_0001>

<bundles_post_ra>
// kernel: tpu_custom_call.1
= control target key start
LH: loop header
LB: loop body
LE: loop exit
PB: predicated region body
PF: predicated region fallthrough
CT: control target
= control target key end

     0   :  { %10 = vsyncpa [#allocation3], 0  ;;  %s1006_s0 = inlined_call_operand.hbm [shape: bf16[2,8,32], index: 0, kind: input, shape index: {}]   ;;  %s1007_s1 = inlined_call_operand.hbm [shape: bf16[32,32], index: 1, kind: input, shape index: {}]   ;;  %s1008_s2 = inlined_call_operand.vmem [shape: f32[1,32], index: 2, kind: input, shape index: {}]   ;;  %s1009_s3 = inlined_call_operand.hbm [shape: bf16[32,32], index: 3, kind: input, shape index: {}]   ;;  %s1010_s4 = inlined_call_operand.vmem [shape: f32[1,32], index: 4, kind: input, shape index: {}]   ;;  %s1011_s5 = inlined_call_operand.hbm [shape: f32[2,8,32], index: 5, kind: output, shape index: {}]  }
   0x1   :  { %12 = vsyncpa [#allocation3 + $0x1], 0 }
   0x2   :  { %13 = vsyncpa [#allocation6], 0 }
   0x3   :  { %14 = vsyncpa [#allocation4], 0 }
   0x4   :  { %16 = vsyncpa [#allocation4 + $0x1], 0  ;;  %s818_s18 = smov 0   ;;  %s820_s19 = smov 0  }
   0x5   :  { %s822_s20 = smov 0   ;;  %s824_s21 = smov 0  }
   0x6 LB: > { %s839_s22 = sadd.s32 4294967295, %s778_s21   ;;  %s511_s23 = sadd.s32 4294967294, %s778_s21   ;;  %s778_s21 = sphi %s824_s21, %s1033_s21   ;;  %s774_s20 = sphi %s822_s20, %s1032_s20   ;;  %s770_s19 = sphi %s820_s19, %s1031_s19   ;;  %s766_s18 = sphi %s818_s18, %s1030_s18  }
   0x7   : > { %p42_p0 = scmp.ne.s32.totalorder %s770_s19, %s766_s18  ;;  %p1012_p1 = scmp.eq.s32.totalorder %s839_s22, 0 }
   0x8   : > { %p156_p3 = scmp.eq.s32.totalorder %s511_s23, 1  ;;  %p512_p5 = scmp.ge.s32.totalorder %s778_s21, 1 }
   0x9   : > { %p848_p4 = por %p1012_p1, %p42_p0  ;;  %p163_p7 = scmp.lt.s32.totalorder %s778_s21, 3 }
   0xa   : > { %p853_p6 = por %p156_p3, %p42_p0  ;;  %s780_s27 = smov [#allocation5]  }
   0xb   : > { %s1016_s24 = scalar_select %p848_p4, 1, 0 }
   0xc   : > { %s1017_s25 = scalar_select %p853_p6, 1, 0 }
   0xd   : > { %p858_p8 = pnand %p512_p5, %p163_p7  ;;  %s175_s28 = sshll.u32 %s780_s27, 4  ;;  %s176_s28 = int_to_ptr.vmem [resolvable:$true] %s175_s28 }
   0xe   : > { %s781_s30 = smov [#allocation7]   ;;  %s641_s7 = scalar_lea.vmem %s176_s28, 256 }
   0xf   : > { %s1018_s26 = scalar_select %p858_p8, 1, 0 }
  0x10   : > { %p567_p9 = pneg %p858_p8  ;;  %s191_s6 = sshll.u32 %s781_s30, 4  ;;  %s192_s6 = int_to_ptr.vmem [resolvable:$true] %s191_s6 }
  0x11   : > { %p642_p13 = scmp.ne.s32.totalorder %s176_s28, %s641_s7  ;;  %p649_p5 = scmp.lt.s32.totalorder %s176_s28, %s176_s28 }
  0x12   : > { %p867_p11 = pnand %p567_p9, %p1012_p1  ;;  %p650_p7 = scmp.lt.s32.totalorder %s641_s7, %s641_s7 }
  0x14   : > { %p632_p12 = pneg %p867_p11  ;;  %p651_p10 = por %p650_p7, %p649_p5 }
  0x16   : > { %p644_p0 = pnand %p642_p13, %p632_p12 }
  0x18   : > { %p645_p3 = pneg %p644_p0 }
  0x1a   : > { %p652_p9 = pnand %p651_p10, %p645_p3 }
  0x1c   : > { %655 = shalt.err (!%p652_p9)
}
  0x1d   : > { %s782_s8 = smov 64   ;;  %s783_s9 = smov 4  }
  0x1e   : > { %570 = dma.hbm_to_vmem [thread:$0]  (!%p867_p11), %s1007_s1, 256, %s176_s28, [#allocation6], %s782_s8, %s782_s8, %s783_s9  }
  0x1f   : > { %s667_s12 = scalar_lea.vmem %s192_s6, 256  ;;  %p675_p2 = scmp.lt.s32.totalorder %s192_s6, %s192_s6 }
  0x20   : > { %p668_p1 = scmp.ne.s32.totalorder %s192_s6, %s667_s12  ;;  %p676_p6 = scmp.lt.s32.totalorder %s667_s12, %s667_s12 }
  0x22   : > { %p670_p13 = pnand %p668_p1, %p632_p12  ;;  %p677_p5 = por %p676_p6, %p675_p2 }
  0x24   : > { %p671_p0 = pneg %p670_p13 }
  0x26   : > { %p678_p10 = pnand %p677_p5, %p671_p0 }
  0x28   : > { %681 = shalt.err (!%p678_p10)
}
  0x29   : > { %573 = dma.hbm_to_vmem [thread:$0]  (!%p867_p11), %s1009_s3, 256, %s192_s6, [#allocation6], %s782_s8, %s782_s8, %s783_s9  }
  0x2a   : > { %s890_s15 = sadd.s32 1, %s778_s21   ;;  %s29_s16 = sadd.s32 1, %s774_s20 }
  0x2b   : > { %s26_s17 = ssub.s32 %s778_s21, %s890_s15  ;;  %p36_p1 = scmp.ne.s32.totalorder %s774_s20, %s770_s19 }
  0x2c   : > { %p27_p2 = scmp.eq.s32.totalorder %s26_s17, 0  ;;  %p37_p6 = scmp.eq.s32.totalorder %s778_s21, 0 }
  0x2d   : > { %p1020_p12 = scmp.eq.s32.totalorder %s839_s22, 1  ;;  %p584_p7 = scmp.lt.s32.totalorder %s778_s21, 2 }
  0x2e   : > { %s906_s27 = scalar_select %p27_p2, %s774_s20, %s29_s16  }
  0x2f   : > { %p900_p3 = por %p1020_p12, %p36_p1  ;;  %p38_p9 = por %p37_p6, %p36_p1 }
  0x30   : > { %s208_s28 = sand.u32 1, %s774_s20   ;;  %s517_s30 = sshll.u32 %s778_s21, 6 }
  0x31   : > { %s1021_s23 = scalar_select %p900_p3, 1, 0 }
  0x32   : > { %s516_s29 = sshll.u32 %s208_s28, 2  ;;  %s913_s8 = scalar_lea.hbm %s1006_s0, %s517_s30 }
  0x33   : > { %s212_s9 = scalar_lea.vmem [#allocation2], %s516_s29  ;;  %p915_p11 = pnand %p584_p7, %p38_p9 }
  0x34   : > { %s219_s10 = sshll.u32 %s212_s9, 4  ;;  %s209_s12 = scalar_lea.sflag [#allocation3], %s208_s28  ;;  %s220_s10 = int_to_ptr.vmem [resolvable:$true] %s219_s10 }
  0x35   : > { %s682_s13 = scalar_lea.hbm %s913_s8, 64  ;;  %p684_p0 = pneg %p915_p11 }
  0x36   : > { %p683_p13 = scmp.ne.s32.totalorder %s913_s8, %s682_s13  ;;  %s687_s17 = scalar_lea.hbm %s1006_s0, 128 }
  0x37   : > { %p688_p1 = scmp.lt.s32.totalorder %s913_s8, %s1006_s0  ;;  %p689_p2 = scmp.lt.s32.totalorder %s687_s17, %s682_s13 }
  0x38   : > { %p685_p5 = pnand %p684_p0, %p683_p13 }
  0x39   : > { %p690_p6 = por %p689_p2, %p688_p1 }
  0x3a   : > { %p686_p10 = pneg %p685_p5 }
  0x3c   : > { %p691_p12 = pnand %p690_p6, %p686_p10 }
  0x3e   : > { %694 = shalt.err (!%p691_p12)
}
  0x3f   : > { %s695_s6 = scalar_lea.vmem %s220_s10, 64  ;;  %s784_s28 = smov [#allocation2]  }
  0x40   : > { %p696_p7 = scmp.ne.s32.totalorder %s220_s10, %s695_s6  ;;  %s700_s7 = sshll.u32 %s784_s28, 4  ;;  %s701_s7 = int_to_ptr.vmem [resolvable:$false] %s700_s7 }
  0x41   : > { %s702_s9 = scalar_lea.vmem %s701_s7, 128  ;;  %p703_p13 = scmp.lt.s32.totalorder %s220_s10, %s701_s7 }
  0x42   : > { %p698_p9 = pnand %p696_p7, %p684_p0  ;;  %p704_p5 = scmp.lt.s32.totalorder %s702_s9, %s695_s6 }
  0x44   : > { %p699_p3 = pneg %p698_p9  ;;  %p705_p4 = por %p704_p5, %p703_p13 }
  0x46   : > { %p706_p8 = pnand %p705_p4, %p699_p3 }
  0x48   : > { %709 = shalt.err (!%p706_p8)
}
  0x49   : > { %577 = dma.hbm_to_vmem [thread:$0]  (!%p915_p11), %s913_s8, 64, %s220_s10, %s209_s12  }
  0x4a   : > { %p1023_p10 = scmp.ne.s32.totalorder %s1018_s26, 0 }
  0x4b   : > { %s936_s13 = sand.u32 (!%p1023_p10), 1, %s770_s19   ;;  %p1024_p0 = scmp.ne.s32.totalorder (!%p1023_p10), %s1016_s24, 0 }
  0x4c   : > { %228 = sbr.rel (%p1023_p10) target bundleno = 512 (0x200), region = 40  ;;  %s519_s14 = sshll.u32 (!%p1023_p10), %s936_s13, 2 }
  0x4d   : > { %s231_s16 = scalar_lea.sflag (!%p1023_p10), [#allocation3], %s936_s13  ;;  %s234_s17 = scalar_lea.vmem (!%p1023_p10), [#allocation2], %s519_s14 }
  0x51   : > { %753 = dma.done.wait (%p1024_p0), %s231_s16, 64  }
  0x52   : > { %755 = vsyncadd (%p1024_p0), %s231_s16, 4294967232  ;;  %p1025_p4 = scmp.eq.s32.totalorder %s839_s22, 0 }
  0x54   : > { %757 = dma.done.wait (%p1025_p4), [#allocation6], 512   ;;  %p1026_p8 = pmov %p1025_p4 }
  0x55   : > { %v785_v0 = vmov 0.0   ;;  %vm786_vm0 = vmmov 0   ;;  %v626_v1 = vld [vmem:[#allocation5 + $0x8] sm:$0xff]   ;;  %v627_v2 = vld [vmem:[#allocation5] sm:$0xff]   ;;  %vm272_vm1 = vcmask 261120   ;;  %v628_v5 = vld [vmem:[#allocation7 + $0x8] sm:$0xff]   ;;  %v403_v23 = vlaneseq }
  0x56   : > { %759 = vsyncadd (%p1026_p8), [#allocation6], 4294966784  ;;  %539 = vmatprep.subr.bf16.mxu0 %v785_v0  ;;  %543 = vmatprep.mubr.msk.bf16.mxu0 %vm786_vm0, %v785_v0  ;;  %v270_v3 = vld [vmem:[%s234_s17] sm:$0xf]  ;;  %v629_v14 = vld [vmem:[#allocation7] sm:$0xff]   ;;  %s522_s8 = sshll.u32 %s936_s13, 3 }
  0x57   : > { %547 = vmatprep.subr.bf16.mxu1 %v785_v0  ;;  %551 = vmatprep.mubr.msk.bf16.mxu1 %vm786_vm0, %v785_v0  ;;  %v271_v4 = vunpack.c.l.bf16 %v270_v3  ;;  %v285_v15 = vld [vmem:[%s1008_s2] sm:$0x1]  ;;  %v404_v24 = vshrl.u32 %v403_v23, 7  ;;  %s530_s12 = sshll.u32 %s839_s22, 7  ;;  %s268_s30 = scalar_lea.vmem [#allocation8], %s522_s8 }
  0x58   : > { %540 = vmatpush3.bf16.msra.mxu0 %v626_v1  ;;  %548 = vmatpush3.bf16.msra.mxu1 %v628_v5  ;;  %v286_v16 = vmul.f32 8.0, %v285_v15  ;;  %v347_v25 = vld [vmem:[%s1010_s4] sm:$0x1]  ;;  %s422_s29 = sshll.u32 %s268_s30, 4  ;;  %s962_s7 = scalar_lea.hbm %s1011_s5, %s530_s12  ;;  %s964_s29 = int_to_ptr.vmem [resolvable:$true] %s422_s29 }
  0x59   : > { %541 = vmatprep.subr.bf16.mxu0 %v785_v0  ;;  %v273_v6 = vsel %vm272_vm1, %v271_v4, 0.0  ;;  %549 = vmatprep.subr.bf16.mxu1 %v785_v0  ;;  %v405_v26 = vsub.s32 0, %v404_v24  ;;  %s409_s22 = scalar_lea.sflag [#allocation4], %s936_s13  ;;  %s710_s9 = scalar_lea.vmem %s964_s29, 128 }
  0x5a   : > { %v274_v7 = vrot.slane %v273_v6, 4  ;;  %p711_p3 = scmp.ne.s32.totalorder %s964_s29, %s710_s9  ;;  %p1027_p11 = scmp.ne.s32.totalorder %s1021_s23, 0 }
  0x5b   : > { %s787_s14 = smov [#allocation8]  }
  0x5c   : > { %542 = vmatpush3.bf16.msra.mxu0 %v627_v2  ;;  %v275_v8 = vadd.f32 %v274_v7, %v273_v6  ;;  %550 = vmatpush3.bf16.msra.mxu1 %v629_v14  ;;  %p712_p1 = pnand %p711_p3, %p1027_p11  ;;  %s714_s16 = sshll.u32 %s787_s14, 4  ;;  %s715_s16 = int_to_ptr.vmem [resolvable:$false] %s714_s16 }
  0x5d   : > { %s716_s17 = scalar_lea.vmem %s715_s16, 256  ;;  %p717_p6 = scmp.lt.s32.totalorder %s964_s29, %s715_s16 }
  0x5e   : > { %v276_v9 = vrot.slane %v275_v8, 2  ;;  %p713_p2 = pneg %p712_p1  ;;  %p718_p12 = scmp.lt.s32.totalorder %s716_s17, %s710_s9 }
  0x60   : > { %v277_v10 = vadd.f32 %v276_v9, %v275_v8  ;;  %p719_p7 = por %p718_p12, %p717_p6 }
  0x62   : > { %v278_v11 = vrot.slane %v277_v10, 1  ;;  %p720_p9 = pnand %p719_p7, %p713_p2 }
  0x64   : > { %v279_v12 = vadd.f32 %v278_v11, %v277_v10 }
  0x66   : > { %v280_v13 = vpack.c.bf16 %v279_v12, %v279_v12 }
  0x68   : > { %544 = vmatmul.mubr.msk.bf16.vlgmr.msra.gmra.mxu0 %vm272_vm1, %v280_v13 }
 0x128   : > { %v336_v17 = vpop.f32.mrf.mxu0 }
 0x129   : > { %v337_v18 = vadd.f32 %v336_v17, %v286_v16 }
 0x12a   : > { %v545_v19 = vpop.f32.mrf.mxu0 }
 0x12b   : > { %v342_v20 = vpack.c.bf16 %v337_v18, %v337_v18 }
 0x12c   : > { %v339_v21 = vpop.f32.mrf.mxu0 }
 0x12d   : > { %552 = vmatmul.mubr.msk.bf16.vlgmr.msra.gmra.mxu1 %vm272_vm1, %v342_v20 }
 0x12e   : > { %v546_v22 = vpop.f32.mrf.mxu0 }
 0x1ed   : > { %v397_v27 = vpop.f32.mrf.mxu1 }
 0x1ee   : > { %v398_v28 = vadd.f32 %v397_v27, %v347_v25 }
 0x1ef   : > { %v553_v29 = vpop.f32.mrf.mxu1 }
 0x1f0   : > { %v406_v30 = vrot.slane %v398_v28, %v405_v26 }
 0x1f1   : > { %v400_v31 = vpop.f32.mrf.mxu1 }
 0x1f2   : > { %407 = vst.msk [vmem:[%s268_s30] sm:$0xff] %vm272_vm1, %v406_v30 }
 0x1f3   : > { %v554_v32 = vpop.f32.mrf.mxu1 }
 0x1f4   : > { %723 = shalt.err (!%p720_p9)
}
 0x1f5   : > { %s724_s24 = scalar_lea.hbm %s962_s7, 128  ;;  %s728_s8 = scalar_lea.hbm %s1011_s5, 256 }
 0x1f6   : > { %p725_p13 = scmp.ne.s32.totalorder %s962_s7, %s724_s24  ;;  %p729_p0 = scmp.lt.s32.totalorder %s962_s7, %s1011_s5 }
 0x1f7   : > { %p730_p4 = scmp.lt.s32.totalorder %s728_s8, %s724_s24 }
 0x1f8   : > { %p726_p5 = pnand %p725_p13, %p1027_p11 }
 0x1f9   : > { %p731_p8 = por %p730_p4, %p729_p0 }
 0x1fa   : > { %p727_p10 = pneg %p726_p5 }
 0x1fc   : > { %p732_p3 = pnand %p731_p8, %p727_p10 }
 0x1fe   : > { %735 = shalt.err (!%p732_p3)
}
 0x1ff   : > { %565 = dma.vmem_to_hbm [thread:$0]  (%p1027_p11), %s964_s29, 128, %s962_s7, %s409_s22  }
 0x200 PF: > { %s434_s12 = sand.u32 1, %s766_s18   ;;  %p1028_p1 = scmp.ne.s32.totalorder %s1017_s25, 0 }
 0x201   : > { %p1029_p2 = scmp.ge.s32.totalorder %s778_s21, 2  ;;  %s435_s30 = scalar_lea.sflag [#allocation4], %s434_s12 }
 0x203   : > { %p579_p6 = pnand %p1029_p2, %p1028_p1 }
 0x205   : > { %p580_p12 = pneg %p579_p6 }
 0x207   : > { %761 = dma.done.wait (%p580_p12), %s435_s30, 128  }
 0x208   : > { %763 = vsyncadd (%p580_p12), %s435_s30, 4294967168  ;;  %p19_p7 = scmp.ge.s32.totalorder %s890_s15, 4   ;;  %s1030_s18 = smov %s770_s19 }
 0x209   : > { %s1031_s19 = smov %s774_s20  ;;  %s1032_s20 = smov %s906_s27 }
 0x20a   : > { %s1033_s21 = smov %s890_s15  ;;  %21 = sbr.rel (!%p19_p7) target bundleno = 6 (0x6), region = 93 }
 0x20f   :  { %440 = vsyncpa [#allocation3], 1 }
 0x210   :  { %442 = vsyncpa [#allocation3 + $0x1], 1 }
 0x211   :  { %443 = vsyncpa [#allocation6], 1 }
 0x212   :  { %444 = vsyncpa [#allocation4], 1 }
 0x213   :  { %446 = vsyncpa [#allocation4 + $0x1], 1 }

</bundles_post_ra>
